<compile_context>
chip_gen: v7x
topology: tpu7x:2x2x1
jax: 0.10.0
libtpu: 0.0.40
codegen_flags: <defaults>
</compile_context>

<pallas_src>
import jax
import jax.numpy as jnp
from jax.experimental import pallas as pl
from jax.experimental.pallas import tpu as pltpu


def _round_up(x, m):
    return ((x + m - 1) // m) * m


def _lstm_rollout_kernel(x_ref, h0_ref, c0_ref,
                         wg_ref, bg_ref, wh_ref, bh_ref,
                         heads_ref, state_ref,
                         h_sc, c_sc):
    """One LSTM timestep per grid iteration (PyTorch gate order i, f, g, o) + fused heads.

    x_ref     : (1, B, IN_P)      f32   -- [z_t | a_t | 0-pad]  for this step
    h0_ref    : (B, H)            f32   -- initial hidden state (resident)
    c0_ref    : (B, H)            f32   -- initial cell state   (resident)
    wg_ref    : (IN_P + H, 4H)    bf16  -- [W_ih (0-padded rows) ; W_hh]  (resident)
    bg_ref    : (1, 4H)           f32   -- b_ih + b_hh                    (resident)
    wh_ref    : (H, HP)           bf16  -- [W_mu | W_log_var | 0-pad]     (resident)
    bh_ref    : (1, HP)           f32   -- [b_mu | b_log_var | 0-pad]     (resident)
    heads_ref : (1, B, HP)        f32   -- per-step [mu | log_var | 0-pad]
    state_ref : (B, 2H)           f32   -- [h_T | c_T] (resident accumulator-style output)
    h_sc/c_sc : (B, H)            f32   -- recurrent carry in VMEM scratch
    """
    t = pl.program_id(0)
    H = h0_ref.shape[-1]
    IN_P = x_ref.shape[-1]

    @pl.when(t == 0)
    def _():
        h_sc[...] = h0_ref[...]
        c_sc[...] = c0_ref[...]

    x = x_ref[0, :, :].astype(jnp.bfloat16)      # (B, IN_P)
    h = h_sc[...].astype(jnp.bfloat16)           # (B, H)

    # Two clean 128-deep MXU passes against one resident fused weight buffer.
    gates = (jnp.dot(x, wg_ref[0:IN_P, :], preferred_element_type=jnp.float32)
             + jnp.dot(h, wg_ref[IN_P:IN_P + H, :], preferred_element_type=jnp.float32)
             + bg_ref[...])                      # (B, 4H) f32

    # Gate nonlinearities in f32 (correct on v5e; EUP handles sigmoid/tanh).
    i_g = jax.nn.sigmoid(gates[:, 0 * H:1 * H])
    f_g = jax.nn.sigmoid(gates[:, 1 * H:2 * H])
    g_g = jnp.tanh(gates[:, 2 * H:3 * H])
    o_g = jax.nn.sigmoid(gates[:, 3 * H:4 * H])

    c1 = f_g * c_sc[...] + i_g * g_g             # c-state carry strictly f32
    h1 = o_g * jnp.tanh(c1)
    c_sc[...] = c1
    h_sc[...] = h1

    # Fused heads matmul: [mu | log_var | 0-pad] in one MXU pass, 128-lane output.
    heads = (jnp.dot(h1.astype(jnp.bfloat16), wh_ref[...],
                     preferred_element_type=jnp.float32)
             + bh_ref[...])                      # (B, HP) f32
    heads_ref[0, :, :] = heads                   # lane-aligned store
    state_ref[:, 0:H] = h1                       # resident; only final value written back
    state_ref[:, H:2 * H] = c1


def aleatoric_predictor_rollout(z_seq, a_seq, params, hidden_state=None):
    """Fused T-step LSTM rollout + heads in a single pallas_call.

    z_seq: (T, B, latent_dim), a_seq: (T, B, action_dim)
    Returns (mu_seq (T,B,L), log_var_seq (T,B,L), (h_T, c_T)) with h/c of shape (1,B,H).
    """
    T, B, L = z_seq.shape
    A = a_seq.shape[-1]
    H = params["rnn_hidden_dim"]
    IN_P = params["in_pad"]
    HP = params["heads_pad"]

    if hidden_state is None:
        h0 = jnp.zeros((B, H), jnp.float32)
        c0 = jnp.zeros((B, H), jnp.float32)
    else:
        h0, c0 = hidden_state
        h0 = h0.reshape(B, H).astype(jnp.float32)
        c0 = c0.reshape(B, H).astype(jnp.float32)

    # [z_t | a_t] per step, zero-padded to a 128-lane contraction dim.
    x = jnp.concatenate([z_seq.astype(jnp.float32), a_seq.astype(jnp.float32)], axis=-1)
    x = jnp.pad(x, ((0, 0), (0, 0), (0, IN_P - (L + A))))

    flops = T * (2 * B * (IN_P + H) * 4 * H + 2 * B * H * HP)
    transcendentals = T * 5 * B * H
    bytes_accessed = (x.size * 4 + 2 * B * H * 4
                      + params["w_gates"].size * 2 + params["b_gates"].size * 4
                      + params["w_heads"].size * 2 + params["b_heads"].size * 4
                      + T * B * HP * 4 + B * 2 * H * 4)

    heads_seq, state = pl.pallas_call(
        _lstm_rollout_kernel,
        out_shape=(jax.ShapeDtypeStruct((T, B, HP), jnp.float32),
                   jax.ShapeDtypeStruct((B, 2 * H), jnp.float32)),
        grid_spec=pltpu.PrefetchScalarGridSpec(
            num_scalar_prefetch=0,
            grid=(T,),
            in_specs=[
                pl.BlockSpec((1, B, IN_P), lambda t: (t, 0, 0)),      # per-step input
                pl.BlockSpec((B, H), lambda t: (0, 0)),               # h0 (resident)
                pl.BlockSpec((B, H), lambda t: (0, 0)),               # c0 (resident)
                pl.BlockSpec((IN_P + H, 4 * H), lambda t: (0, 0)),    # fused gate weights
                pl.BlockSpec((1, 4 * H), lambda t: (0, 0)),           # gate bias
                pl.BlockSpec((H, HP), lambda t: (0, 0)),              # fused head weights
                pl.BlockSpec((1, HP), lambda t: (0, 0)),              # head bias
            ],
            out_specs=[
                pl.BlockSpec((1, B, HP), lambda t: (t, 0, 0)),        # per-step heads
                pl.BlockSpec((B, 2 * H), lambda t: (0, 0)),           # final [h | c]
            ],
            scratch_shapes=[pltpu.VMEM((B, H), jnp.float32),          # h carry
                            pltpu.VMEM((B, H), jnp.float32)]),        # c carry
        compiler_params=pltpu.CompilerParams(
            dimension_semantics=("arbitrary",)),                      # recurrent axis
        cost_estimate=pl.CostEstimate(flops=flops,
                                      transcendentals=transcendentals,
                                      bytes_accessed=bytes_accessed),
    )(x, h0, c0,
      params["w_gates"], params["b_gates"],
      params["w_heads"], params["b_heads"])

    mu_seq = heads_seq[..., 0:L]
    log_var_seq = heads_seq[..., L:2 * L]
    next_hidden_state = (state[None, :, 0:H], state[None, :, H:2 * H])
    return mu_seq, log_var_seq, next_hidden_state


def aleatoric_predictor_forward(z_t, a_t, params, hidden_state=None):
    """Pallas equivalent of AleatoricPredictor.forward — thin T=1 case of the rollout."""
    mu_seq, log_var_seq, next_hidden_state = aleatoric_predictor_rollout(
        z_t[None], a_t[None], params, hidden_state)
    return mu_seq[0], log_var_seq[0], next_hidden_state


def init_params(key, latent_dim, action_dim, rnn_hidden_dim):
    """Deterministic synthetic parameters (PyTorch-style uniform init), pre-fused/padded/bf16."""
    in_dim = latent_dim + action_dim
    H = rnn_hidden_dim
    IN_P = _round_up(in_dim, 128)          # padded contraction lanes for the x part
    HP = _round_up(2 * latent_dim, 128)    # padded head output lanes
    k = 1.0 / float(H) ** 0.5
    keys = jax.random.split(key, 8)

    def u(k_, shape):
        return jax.random.uniform(k_, shape, jnp.float32, minval=-k, maxval=k)

    # stored transposed: (in_dim, out_dim) so the kernel does x @ W
    w_ih = u(keys[0], (in_dim, 4 * H))
    w_hh = u(keys[1], (H, 4 * H))
    b_ih = u(keys[2], (1, 4 * H))
    b_hh = u(keys[3], (1, 4 * H))
    w_mu = u(keys[4], (H, latent_dim))
    b_mu = u(keys[5], (1, latent_dim))
    w_lv = u(keys[6], (H, latent_dim))
    b_lv = u(keys[7], (1, latent_dim))

    # Fused, padded gate weights: rows [0, in_dim) = W_ih, rows [IN_P, IN_P+H) = W_hh.
    w_gates = jnp.zeros((IN_P + H, 4 * H), jnp.float32)
    w_gates = w_gates.at[:in_dim].set(w_ih).at[IN_P:IN_P + H].set(w_hh)

    # Fused, padded head weights/biases: [mu | log_var | 0-pad] on the output dim.
    w_heads = jnp.zeros((H, HP), jnp.float32)
    w_heads = w_heads.at[:, :latent_dim].set(w_mu)
    w_heads = w_heads.at[:, latent_dim:2 * latent_dim].set(w_lv)
    b_heads = jnp.zeros((1, HP), jnp.float32)
    b_heads = b_heads.at[:, :latent_dim].set(b_mu)
    b_heads = b_heads.at[:, latent_dim:2 * latent_dim].set(b_lv)

    return dict(
        w_gates=w_gates.astype(jnp.bfloat16),
        b_gates=(b_ih + b_hh),
        w_heads=w_heads.astype(jnp.bfloat16),
        b_heads=b_heads,
        latent_dim=latent_dim, action_dim=action_dim, rnn_hidden_dim=H,
        in_pad=IN_P, heads_pad=HP)


def reference_rollout(z_seq, a_seq, params, hidden_state=None):
    """Pure-JAX reference mirroring the kernel arithmetic (bf16 MXU inputs, f32 math/state)."""
    T, B, L = z_seq.shape
    A = a_seq.shape[-1]
    H = params["rnn_hidden_dim"]
    IN_P = params["in_pad"]

    w_ih = params["w_gates"][:IN_P]
    w_hh = params["w_gates"][IN_P:IN_P + H]
    w_h = params["w_heads"]
    b_g = params["b_gates"]
    b_h = params["b_heads"]

    if hidden_state is None:
        h = jnp.zeros((B, H), jnp.float32)
        c = jnp.zeros((B, H), jnp.float32)
    else:
        h, c = hidden_state
        h = h.reshape(B, H).astype(jnp.float32)
        c = c.reshape(B, H).astype(jnp.float32)

    x = jnp.concatenate([z_seq.astype(jnp.float32), a_seq.astype(jnp.float32)], axis=-1)
    x = jnp.pad(x, ((0, 0), (0, 0), (0, IN_P - (L + A))))

    mus, lvs = [], []
    for t in range(T):
        gates = (jnp.dot(x[t].astype(jnp.bfloat16), w_ih, preferred_element_type=jnp.float32)
                 + jnp.dot(h.astype(jnp.bfloat16), w_hh, preferred_element_type=jnp.float32)
                 + b_g)
        i_g = jax.nn.sigmoid(gates[:, 0 * H:1 * H])
        f_g = jax.nn.sigmoid(gates[:, 1 * H:2 * H])
        g_g = jnp.tanh(gates[:, 2 * H:3 * H])
        o_g = jax.nn.sigmoid(gates[:, 3 * H:4 * H])
        c = f_g * c + i_g * g_g
        h = o_g * jnp.tanh(c)
        heads = jnp.dot(h.astype(jnp.bfloat16), w_h, preferred_element_type=jnp.float32) + b_h
        mus.append(heads[:, :L])
        lvs.append(heads[:, L:2 * L])
    return jnp.stack(mus), jnp.stack(lvs), (h[None], c[None])


if __name__ == "__main__":
    latent_dim, action_dim, rnn_hidden_dim = 32, 8, 128
    batch, seq = 2, 8
    tol = 2e-2

    key = jax.random.PRNGKey(0)
    k_p, k_z, k_a, k_zs, k_as = jax.random.split(key, 5)
    params = init_params(k_p, latent_dim, action_dim, rnn_hidden_dim)

    # ---- single-step forward (matches the PyTorch module's forward signature) ----
    z_t = jax.random.normal(k_z, (batch, latent_dim), jnp.float32)
    a_t = jax.random.normal(k_a, (batch, action_dim), jnp.float32)
    mu, log_var, (h1, c1) = aleatoric_predictor_forward(z_t, a_t, params)
    jax.block_until_ready((mu, log_var, h1, c1))

    assert mu.shape == (batch, latent_dim)
    assert log_var.shape == (batch, latent_dim)
    assert h1.shape == (1, batch, rnn_hidden_dim)
    assert c1.shape == (1, batch, rnn_hidden_dim)

    mu_r, lv_r, (h1_r, c1_r) = reference_rollout(z_t[None], a_t[None], params)
    assert jnp.allclose(mu, mu_r[0], atol=tol)
    assert jnp.allclose(log_var, lv_r[0], atol=tol)
    assert jnp.allclose(h1, h1_r, atol=tol)
    assert jnp.allclose(c1, c1_r, atol=tol)

    # ---- fused multi-step rollout (grid over T, weights resident, h/c in scratch) ----
    z_seq = jax.random.normal(k_zs, (seq, batch, latent_dim), jnp.float32)
    a_seq = jax.random.normal(k_as, (seq, batch, action_dim), jnp.float32)
    mu_s, lv_s, (hT, cT) = aleatoric_predictor_rollout(z_seq, a_seq, params)
    jax.block_until_ready((mu_s, lv_s, hT, cT))

    mu_sr, lv_sr, (hT_r, cT_r) = reference_rollout(z_seq, a_seq, params)
    assert mu_s.shape == (seq, batch, latent_dim)
    assert lv_s.shape == (seq, batch, latent_dim)
    assert jnp.allclose(mu_s, mu_sr, atol=tol)
    assert jnp.allclose(lv_s, lv_sr, atol=tol)
    assert jnp.allclose(hT, hT_r, atol=tol)
    assert jnp.allclose(cT, cT_r, atol=tol)

    print("KERNEL_OK")
</pallas_src>

<mosaic_0001>
module attributes {stable_mosaic.version = 11 : i64} {
  func.func @_lstm_rollout_kernel(%arg0: i32, %arg1: memref<1x2x128xf32, #tpu.memory_space<vmem>>, %arg2: memref<2x128xf32, #tpu.memory_space<vmem>>, %arg3: memref<2x128xf32, #tpu.memory_space<vmem>>, %arg4: memref<256x512xbf16, #tpu.memory_space<vmem>>, %arg5: memref<1x512xf32, #tpu.memory_space<vmem>>, %arg6: memref<128x128xbf16, #tpu.memory_space<vmem>>, %arg7: memref<1x128xf32, #tpu.memory_space<vmem>>, %arg8: memref<1x2x128xf32, #tpu.memory_space<vmem>>, %arg9: memref<2x256xf32, #tpu.memory_space<vmem>>, %arg10: memref<2x128xf32, #tpu.memory_space<vmem>>, %arg11: memref<2x128xf32, #tpu.memory_space<vmem>>) attributes {dimension_semantics = [#tpu.dimension_semantics<arbitrary>], iteration_bounds = array<i64: 1>, scalar_prefetch = 0 : i64, scratch_operands = 2 : i64, tpu.core_type = #tpu.core_type<tc>, window_params = [{transform_indices = @transform_0, window_bounds = array<i64: 1, 2, 128>}, {pipeline_mode = #tpu.pipeline_mode<synchronous>, transform_indices = @transform_1, window_bounds = array<i64: 2, 128>}, {pipeline_mode = #tpu.pipeline_mode<synchronous>, transform_indices = @transform_2, window_bounds = array<i64: 2, 128>}, {pipeline_mode = #tpu.pipeline_mode<synchronous>, transform_indices = @transform_3, window_bounds = array<i64: 256, 512>}, {pipeline_mode = #tpu.pipeline_mode<synchronous>, transform_indices = @transform_4, window_bounds = array<i64: 1, 512>}, {pipeline_mode = #tpu.pipeline_mode<synchronous>, transform_indices = @transform_5, window_bounds = array<i64: 128, 128>}, {pipeline_mode = #tpu.pipeline_mode<synchronous>, transform_indices = @transform_6, window_bounds = array<i64: 1, 128>}, {transform_indices = @transform_7, window_bounds = array<i64: 1, 2, 128>}, {pipeline_mode = #tpu.pipeline_mode<synchronous>, transform_indices = @transform_8, window_bounds = array<i64: 2, 256>}]} {
    %c0_i32 = arith.constant 0 : i32
    %0 = arith.cmpi eq, %arg0, %c0_i32 : i32
    %1 = arith.extui %0 : i1 to i32
    %c0_i32_0 = arith.constant 0 : i32
    %2 = arith.cmpi ne, %1, %c0_i32_0 : i32
    scf.if %2 {
      %c0_32 = arith.constant 0 : index
      %c0_33 = arith.constant 0 : index
      %55 = vector.load %arg2[%c0_32, %c0_33] : memref<2x128xf32, #tpu.memory_space<vmem>>, vector<2x128xf32>
      %c0_34 = arith.constant 0 : index
      %c0_35 = arith.constant 0 : index
      %56 = vector.load %arg10[%c0_34, %c0_35] : memref<2x128xf32, #tpu.memory_space<vmem>>, vector<2x128xf32>
      tpu.vector_store %arg10[%c0_34, %c0_35], %55 {strides = array<i32>} : memref<2x128xf32, #tpu.memory_space<vmem>>, vector<2x128xf32>,
      %c0_36 = arith.constant 0 : index
      %c0_37 = arith.constant 0 : index
      %57 = vector.load %arg3[%c0_36, %c0_37] : memref<2x128xf32, #tpu.memory_space<vmem>>, vector<2x128xf32>
      %c0_38 = arith.constant 0 : index
      %c0_39 = arith.constant 0 : index
      %58 = vector.load %arg11[%c0_38, %c0_39] : memref<2x128xf32, #tpu.memory_space<vmem>>, vector<2x128xf32>
      tpu.vector_store %arg11[%c0_38, %c0_39], %57 {strides = array<i32>} : memref<2x128xf32, #tpu.memory_space<vmem>>, vector<2x128xf32>,
    } else {
    }
    %c0 = arith.constant 0 : index
    %c0_1 = arith.constant 0 : index
    %c0_2 = arith.constant 0 : index
    %3 = vector.load %arg1[%c0, %c0_1, %c0_2] : memref<1x2x128xf32, #tpu.memory_space<vmem>>, vector<1x2x128xf32>
    %4 = vector.shape_cast %3 : vector<1x2x128xf32> to vector<2x128xf32>
    %5 = arith.truncf %4 : vector<2x128xf32> to vector<2x128xbf16>
    %c0_3 = arith.constant 0 : index
    %c0_4 = arith.constant 0 : index
    %6 = vector.load %arg10[%c0_3, %c0_4] : memref<2x128xf32, #tpu.memory_space<vmem>>, vector<2x128xf32>
    %7 = arith.truncf %6 : vector<2x128xf32> to vector<2x128xbf16>
    %c0_5 = arith.constant 0 : index
    %c0_6 = arith.constant 0 : index
    %8 = vector.load %arg4[%c0_5, %c0_6] : memref<256x512xbf16, #tpu.memory_space<vmem>>, vector<128x512xbf16>
    %cst = arith.constant dense<0.000000e+00> : vector<2x512xf32>
    %9 = tpu.matmul %5, %8, %cst {dimension_numbers = #tpu.dot_dimension_numbers<[1], [0], [0], [1], [0, 0, 1, 1], [], []>} : vector<2x128xbf16>, vector<128x512xbf16>, vector<2x512xf32> -> vector<2x512xf32>
    %c128 = arith.constant 128 : index
    %c0_7 = arith.constant 0 : index
    %10 = vector.load %arg4[%c128, %c0_7] : memref<256x512xbf16, #tpu.memory_space<vmem>>, vector<128x512xbf16>
    %cst_8 = arith.constant dense<0.000000e+00> : vector<2x512xf32>
    %11 = tpu.matmul %7, %10, %cst_8 {dimension_numbers = #tpu.dot_dimension_numbers<[1], [0], [0], [1], [0, 0, 1, 1], [], []>} : vector<2x128xbf16>, vector<128x512xbf16>, vector<2x512xf32> -> vector<2x512xf32>
    %12 = arith.addf %9, %11 : vector<2x512xf32>
    %c0_9 = arith.constant 0 : index
    %c0_10 = arith.constant 0 : index
    %13 = vector.load %arg5[%c0_9, %c0_10] : memref<1x512xf32, #tpu.memory_space<vmem>>, vector<1x512xf32>
    %14 = vector.broadcast %13 : vector<1x512xf32> to vector<2x512xf32>
    %15 = arith.addf %12, %14 : vector<2x512xf32>
    %16 = vector.extract_strided_slice %15 {offsets = [0, 0], sizes = [2, 128], strides = [1, 1]} : vector<2x512xf32> to vector<2x128xf32>
    %17 = arith.negf %16 : vector<2x128xf32>
    %18 = math.exp %17 : vector<2x128xf32>
    %cst_11 = arith.constant 1.000000e+00 : f32
    %19 = vector.broadcast %cst_11 : f32 to vector<2x128xf32>
    %20 = arith.addf %19, %18 : vector<2x128xf32>
    %21 = arith.divf %19, %20 : vector<2x128xf32>
    %22 = vector.extract_strided_slice %15 {offsets = [0, 128], sizes = [2, 128], strides = [1, 1]} : vector<2x512xf32> to vector<2x128xf32>
    %23 = arith.negf %22 : vector<2x128xf32>
    %24 = math.exp %23 : vector<2x128xf32>
    %cst_12 = arith.constant 1.000000e+00 : f32
    %25 = vector.broadcast %cst_12 : f32 to vector<2x128xf32>
    %26 = arith.addf %25, %24 : vector<2x128xf32>
    %27 = arith.divf %25, %26 : vector<2x128xf32>
    %28 = vector.extract_strided_slice %15 {offsets = [0, 256], sizes = [2, 128], strides = [1, 1]} : vector<2x512xf32> to vector<2x128xf32>
    %29 = math.tanh %28 : vector<2x128xf32>
    %30 = vector.extract_strided_slice %15 {offsets = [0, 384], sizes = [2, 128], strides = [1, 1]} : vector<2x512xf32> to vector<2x128xf32>
    %31 = arith.negf %30 : vector<2x128xf32>
    %32 = math.exp %31 : vector<2x128xf32>
    %cst_13 = arith.constant 1.000000e+00 : f32
    %33 = vector.broadcast %cst_13 : f32 to vector<2x128xf32>
    %34 = arith.addf %33, %32 : vector<2x128xf32>
    %35 = arith.divf %33, %34 : vector<2x128xf32>
    %c0_14 = arith.constant 0 : index
    %c0_15 = arith.constant 0 : index
    %36 = vector.load %arg11[%c0_14, %c0_15] : memref<2x128xf32, #tpu.memory_space<vmem>>, vector<2x128xf32>
    %37 = arith.mulf %27, %36 : vector<2x128xf32>
    %38 = arith.mulf %21, %29 : vector<2x128xf32>
    %39 = arith.addf %37, %38 : vector<2x128xf32>
    %40 = math.tanh %39 : vector<2x128xf32>
    %41 = arith.mulf %35, %40 : vector<2x128xf32>
    %c0_16 = arith.constant 0 : index
    %c0_17 = arith.constant 0 : index
    %42 = vector.load %arg11[%c0_16, %c0_17] : memref<2x128xf32, #tpu.memory_space<vmem>>, vector<2x128xf32>
    tpu.vector_store %arg11[%c0_16, %c0_17], %39 {strides = array<i32>} : memref<2x128xf32, #tpu.memory_space<vmem>>, vector<2x128xf32>,
    %c0_18 = arith.constant 0 : index
    %c0_19 = arith.constant 0 : index
    %43 = vector.load %arg10[%c0_18, %c0_19] : memref<2x128xf32, #tpu.memory_space<vmem>>, vector<2x128xf32>
    tpu.vector_store %arg10[%c0_18, %c0_19], %41 {strides = array<i32>} : memref<2x128xf32, #tpu.memory_space<vmem>>, vector<2x128xf32>,
    %44 = arith.truncf %41 : vector<2x128xf32> to vector<2x128xbf16>
    %c0_20 = arith.constant 0 : index
    %c0_21 = arith.constant 0 : index
    %45 = vector.load %arg6[%c0_20, %c0_21] : memref<128x128xbf16, #tpu.memory_space<vmem>>, vector<128x128xbf16>
    %cst_22 = arith.constant dense<0.000000e+00> : vector<2x128xf32>
    %46 = tpu.matmul %44, %45, %cst_22 {dimension_numbers = #tpu.dot_dimension_numbers<[1], [0], [0], [1], [0, 0, 1, 1], [], []>} : vector<2x128xbf16>, vector<128x128xbf16>, vector<2x128xf32> -> vector<2x128xf32>
    %c0_23 = arith.constant 0 : index
    %c0_24 = arith.constant 0 : index
    %47 = vector.load %arg7[%c0_23, %c0_24] : memref<1x128xf32, #tpu.memory_space<vmem>>, vector<1x128xf32>
    %48 = vector.broadcast %47 : vector<1x128xf32> to vector<2x128xf32>
    %49 = arith.addf %46, %48 : vector<2x128xf32>
    %c0_25 = arith.constant 0 : index
    %c0_26 = arith.constant 0 : index
    %c0_27 = arith.constant 0 : index
    %50 = vector.load %arg8[%c0_25, %c0_26, %c0_27] : memref<1x2x128xf32, #tpu.memory_space<vmem>>, vector<1x2x128xf32>
    %51 = vector.shape_cast %50 : vector<1x2x128xf32> to vector<2x128xf32>
    %52 = vector.shape_cast %49 : vector<2x128xf32> to vector<1x2x128xf32>
    tpu.vector_store %arg8[%c0_25, %c0_26, %c0_27], %52 {strides = array<i32>} : memref<1x2x128xf32, #tpu.memory_space<vmem>>, vector<1x2x128xf32>,
    %c0_28 = arith.constant 0 : index
    %c0_29 = arith.constant 0 : index
    %53 = vector.load %arg9[%c0_28, %c0_29] : memref<2x256xf32, #tpu.memory_space<vmem>>, vector<2x128xf32>
    tpu.vector_store %arg9[%c0_28, %c0_29], %41 {strides = array<i32>} : memref<2x256xf32, #tpu.memory_space<vmem>>, vector<2x128xf32>,
    %c0_30 = arith.constant 0 : index
    %c128_31 = arith.constant 128 : index
    %54 = vector.load %arg9[%c0_30, %c128_31] : memref<2x256xf32, #tpu.memory_space<vmem>>, vector<2x128xf32>
    tpu.vector_store %arg9[%c0_30, %c128_31], %39 {strides = array<i32>} : memref<2x256xf32, #tpu.memory_space<vmem>>, vector<2x128xf32>,
    return
  }
  func.func @transform_0(%arg0: i32) -> (i32, i32, i32) {
    %c0_i32 = arith.constant 0 : i32
    %c0_i32_0 = arith.constant 0 : i32
    %c0_i32_1 = arith.constant 0 : i32
    return %arg0, %c0_i32, %c0_i32_0 : i32, i32, i32
  }
  func.func @transform_1(%arg0: i32) -> (i32, i32) {
    %c0_i32 = arith.constant 0 : i32
    %c0_i32_0 = arith.constant 0 : i32
    %c0_i32_1 = arith.constant 0 : i32
    return %c0_i32, %c0_i32_0 : i32, i32
  }
  func.func @transform_2(%arg0: i32) -> (i32, i32) {
    %c0_i32 = arith.constant 0 : i32
    %c0_i32_0 = arith.constant 0 : i32
    %c0_i32_1 = arith.constant 0 : i32
    return %c0_i32, %c0_i32_0 : i32, i32
  }
  func.func @transform_3(%arg0: i32) -> (i32, i32) {
    %c0_i32 = arith.constant 0 : i32
    %c0_i32_0 = arith.constant 0 : i32
    %c0_i32_1 = arith.constant 0 : i32
    return %c0_i32, %c0_i32_0 : i32, i32
  }
  func.func @transform_4(%arg0: i32) -> (i32, i32) {
    %c0_i32 = arith.constant 0 : i32
    %c0_i32_0 = arith.constant 0 : i32
    %c0_i32_1 = arith.constant 0 : i32
    return %c0_i32, %c0_i32_0 : i32, i32
  }
  func.func @transform_5(%arg0: i32) -> (i32, i32) {
    %c0_i32 = arith.constant 0 : i32
    %c0_i32_0 = arith.constant 0 : i32
    %c0_i32_1 = arith.constant 0 : i32
    return %c0_i32, %c0_i32_0 : i32, i32
  }
  func.func @transform_6(%arg0: i32) -> (i32, i32) {
    %c0_i32 = arith.constant 0 : i32
    %c0_i32_0 = arith.constant 0 : i32
    %c0_i32_1 = arith.constant 0 : i32
    return %c0_i32, %c0_i32_0 : i32, i32
  }
  func.func @transform_7(%arg0: i32) -> (i32, i32, i32) {
    %c0_i32 = arith.constant 0 : i32
    %c0_i32_0 = arith.constant 0 : i32
    %c0_i32_1 = arith.constant 0 : i32
    return %arg0, %c0_i32, %c0_i32_0 : i32, i32, i32
  }
  func.func @transform_8(%arg0: i32) -> (i32, i32) {
    %c0_i32 = arith.constant 0 : i32
    %c0_i32_0 = arith.constant 0 : i32
    %c0_i32_1 = arith.constant 0 : i32
    return %c0_i32, %c0_i32_0 : i32, i32
  }
}

</mosaic_0001>

<bundles_post_ra>
// kernel: tpu_custom_call.1
= control target key start
LH: loop header
LB: loop body
LE: loop exit
PB: predicated region body
PF: predicated region fallthrough
CT: control target
= control target key end

     0   :  { %14 = vsyncpa [#allocation5], 0  ;;  %s1364_s0 = inlined_call_operand.hbm [shape: f32[1,2,128], index: 0, kind: input, shape index: {}]   ;;  %s1365_s1 = inlined_call_operand.vmem [shape: f32[2,128], index: 1, kind: input, shape index: {}]   ;;  %s1366_s2 = inlined_call_operand.hbm [shape: f32[2,128], index: 2, kind: input, shape index: {}]   ;;  %s1367_s3 = inlined_call_operand.hbm [shape: bf16[256,512], index: 3, kind: input, shape index: {}]   ;;  %s1368_s4 = inlined_call_operand.vmem [shape: f32[1,512], index: 4, kind: input, shape index: {}]   ;;  %s1369_s5 = inlined_call_operand.hbm [shape: bf16[128,128], index: 5, kind: input, shape index: {}]   ;;  %s1370_s6 = inlined_call_operand.vmem [shape: f32[1,128], index: 6, kind: input, shape index: {}]   ;;  %s1371_s7 = inlined_call_operand.hbm [shape: f32[1,2,128], index: 7, kind: output, shape index: {0}]   ;;  %s1372_s8 = inlined_call_operand.hbm [shape: f32[2,256], index: 8, kind: output, shape index: {1}]  }
   0x1   :  { %15 = vsyncpa [#allocation8], 0 }
   0x2   :  { %16 = vsyncpa [#allocation11], 0 }
   0x3   :  { %17 = vsyncpa [#allocation6], 0 }
   0x4   :  { %18 = vsyncpa [#allocation14], 0  ;;  %s1221_s27 = smov [#allocation7]   ;;  %s1222_s29 = smov [#allocation4]  }
   0x5   :  { %s37_s28 = sshll.u32 %s1221_s27, 4  ;;  %s25_s30 = sshll.u32 %s1222_s29, 4  ;;  %s38_s28 = int_to_ptr.vmem [resolvable:$true] %s37_s28  ;;  %s26_s30 = int_to_ptr.vmem [resolvable:$true] %s25_s30 }
   0x6   :  { %s1079_s11 = scalar_lea.hbm %s1366_s2, 32 }
   0x7   :  { %p1080_p0 = scmp.ne.s32.totalorder %s1366_s2, %s1079_s11  ;;  %p1083_p1 = scmp.lt.u32.totalorder %s1079_s11, %s1366_s2 }
   0x9   :  { %p1085_p2 = pnand %p1083_p1, %p1080_p0 }
   0xb   :  { %1088 = shalt.err (!%p1085_p2)
}
   0xc   :  { %s1089_s16 = scalar_lea.vmem %s38_s28, 32  ;;  %p1094_p4 = scmp.lt.s32.totalorder %s38_s28, %s38_s28 }
   0xd   :  { %p1090_p3 = scmp.ne.s32.totalorder %s38_s28, %s1089_s16  ;;  %p1095_p5 = scmp.lt.s32.totalorder %s1089_s16, %s1089_s16 }
   0xf   :  { %p1096_p6 = por %p1095_p5, %p1094_p4 }
  0x11   :  { %p1097_p7 = pnand %p1096_p6, %p1090_p3 }
  0x13   :  { %1100 = shalt.err (!%p1097_p7)
}
  0x14   :  { %40 = dma.hbm_to_vmem [thread:$0]  %s1366_s2, 32, %s38_s28, [#allocation8]  }
  0x15   :  { %s1101_s21 = scalar_lea.hbm %s1364_s0, 32 }
  0x16   :  { %p1102_p8 = scmp.ne.s32.totalorder %s1364_s0, %s1101_s21  ;;  %p1105_p9 = scmp.lt.u32.totalorder %s1101_s21, %s1364_s0 }
  0x18   :  { %p1107_p10 = pnand %p1105_p9, %p1102_p8 }
  0x1a   :  { %1110 = shalt.err (!%p1107_p10)
}
  0x1b   :  { %s1111_s26 = scalar_lea.vmem %s26_s30, 32  ;;  %p1116_p12 = scmp.lt.s32.totalorder %s26_s30, %s26_s30 }
  0x1c   :  { %p1112_p11 = scmp.ne.s32.totalorder %s26_s30, %s1111_s26  ;;  %p1117_p13 = scmp.lt.s32.totalorder %s1111_s26, %s1111_s26 }
  0x1e   :  { %p1118_p0 = por %p1117_p13, %p1116_p12 }
  0x20   :  { %p1119_p1 = pnand %p1118_p0, %p1112_p11 }
  0x22   :  { %1122 = shalt.err (!%p1119_p1)
}
  0x23   :  { %28 = dma.hbm_to_vmem [thread:$0]  %s1364_s0, 32, %s26_s30, [#allocation5]  }
  0x24   :  { %s1223_s28 = smov [#allocation9]   ;;  %s1123_s11 = scalar_lea.hbm %s1367_s3, 8192 }
  0x25   :  { %s46_s29 = sshll.u32 %s1223_s28, 4  ;;  %p1124_p2 = scmp.ne.s32.totalorder %s1367_s3, %s1123_s11  ;;  %s47_s29 = int_to_ptr.vmem [resolvable:$true] %s46_s29 }
  0x26   :  { %p1127_p3 = scmp.lt.u32.totalorder %s1123_s11, %s1367_s3 }
  0x28   :  { %p1129_p4 = pnand %p1127_p3, %p1124_p2 }
  0x2a   :  { %1132 = shalt.err (!%p1129_p4)
}
  0x2b   :  { %s1133_s16 = scalar_lea.vmem %s47_s29, 8192  ;;  %p1138_p6 = scmp.lt.s32.totalorder %s47_s29, %s47_s29 }
  0x2c   :  { %p1134_p5 = scmp.ne.s32.totalorder %s47_s29, %s1133_s16  ;;  %p1139_p7 = scmp.lt.s32.totalorder %s1133_s16, %s1133_s16 }
  0x2e   :  { %p1140_p8 = por %p1139_p7, %p1138_p6 }
  0x30   :  { %p1141_p9 = pnand %p1140_p8, %p1134_p5 }
  0x32   :  { %1144 = shalt.err (!%p1141_p9)
}
  0x33   :  { %s1224_s0 = smov 256   ;;  %s1225_s30 = smov 16  }
  0x34   :  { %52 = dma.hbm_to_vmem [thread:$0]  %s1367_s3, 8192, %s47_s29, [#allocation8], %s1224_s0, %s1224_s0, %s1225_s30  }
  0x35   :  { %s1226_s19 = smov [#allocation10]   ;;  %s1145_s23 = scalar_lea.hbm %s1369_s5, 1024 }
  0x36   :  { %s60_s20 = sshll.u32 %s1226_s19, 4  ;;  %p1146_p10 = scmp.ne.s32.totalorder %s1369_s5, %s1145_s23  ;;  %s61_s20 = int_to_ptr.vmem [resolvable:$true] %s60_s20 }
  0x37   :  { %p1149_p11 = scmp.lt.u32.totalorder %s1145_s23, %s1369_s5 }
  0x39   :  { %p1151_p12 = pnand %p1149_p11, %p1146_p10 }
  0x3b   :  { %1154 = shalt.err (!%p1151_p12)
}
  0x3c   :  { %s1155_s27 = scalar_lea.vmem %s61_s20, 1024  ;;  %p1160_p0 = scmp.lt.s32.totalorder %s61_s20, %s61_s20 }
  0x3d   :  { %p1156_p13 = scmp.ne.s32.totalorder %s61_s20, %s1155_s27  ;;  %p1161_p1 = scmp.lt.s32.totalorder %s1155_s27, %s1155_s27 }
  0x3f   :  { %p1162_p2 = por %p1161_p1, %p1160_p0 }
  0x41   :  { %p1163_p3 = pnand %p1162_p2, %p1156_p13 }
  0x43   :  { %1166 = shalt.err (!%p1163_p3)
}
  0x44   :  { %s1227_s3 = smov 64   ;;  %s1228_s28 = smov 4  }
  0x45   :  { %66 = dma.hbm_to_vmem [thread:$0]  %s1369_s5, 1024, %s61_s20, [#allocation11], %s1227_s3, %s1227_s3, %s1228_s28  }
  0x46   :  { %1211 = dma.done.wait [#allocation5], 32  }
  0x47   :  { %1212 = vsyncadd [#allocation5], 4294967264 }
  0x48   :  { %1213 = dma.done.wait [#allocation8], 8224  }
  0x49   :  { %1214 = vsyncadd [#allocation8], 4294959072 }
  0x4a   :  { %1215 = dma.done.wait [#allocation11], 1024  }
  0x4b   :  { %1216 = vsyncadd [#allocation11], 4294966272  ;;  %v1229_v0 = vmov 0   ;;  %v959_v1 = vld [vmem:[#allocation9 + $0x104] ss:$16 sps:$4 sm:$0xff]   ;;  %vm1231_vm0 = vmmov 0  }
  0x4c   :  { %350 = vmatprep.mubr.bf16.mxu0 %v1229_v0  ;;  %391 = vmatprep.mubr.bf16.mxu1 %v1229_v0  ;;  %v961_v2 = vld [vmem:[#allocation9 + $0x10c] ss:$16 sps:$4 sm:$0xff]   ;;  %v963_v3 = vld [vmem:[#allocation9 + $0x100] ss:$16 sps:$4 sm:$0xff]   ;;  %v964_v4 = vld [vmem:[#allocation9 + $0x108] ss:$16 sps:$4 sm:$0xff]  }
  0x4d   :  { %318 = vmatprep.subr.bf16.mxu0 %v959_v1  ;;  %359 = vmatprep.subr.bf16.mxu1 %v961_v2  ;;  %v965_v5 = vld [vmem:[#allocation9 + $0x124] ss:$16 sps:$4 sm:$0xff]   ;;  %v967_v6 = vld [vmem:[#allocation9 + $0x12c] ss:$16 sps:$4 sm:$0xff]   ;;  %v969_v7 = vld [vmem:[#allocation9 + $0x120] ss:$16 sps:$4 sm:$0xff]  }
  0x4e   :  { %319 = vmatpush1.bf16.msra.mxu0 %v963_v3  ;;  %360 = vmatpush1.bf16.msra.mxu1 %v964_v4  ;;  %v970_v8 = vld [vmem:[#allocation9 + $0x128] ss:$16 sps:$4 sm:$0xff]   ;;  %v971_v9 = vld [vmem:[#allocation9 + $0x144] ss:$16 sps:$4 sm:$0xff]   ;;  %v973_v10 = vld [vmem:[#allocation9 + $0x14c] ss:$16 sps:$4 sm:$0xff]  }
  0x4f   :  { %320 = vmatprep.subr.bf16.mxu0 %v965_v5  ;;  %361 = vmatprep.subr.bf16.mxu1 %v967_v6  ;;  %v975_v11 = vld [vmem:[#allocation9 + $0x140] ss:$16 sps:$4 sm:$0xff]   ;;  %v976_v12 = vld [vmem:[#allocation9 + $0x148] ss:$16 sps:$4 sm:$0xff]   ;;  %v977_v13 = vld [vmem:[#allocation9 + $0x164] ss:$16 sps:$4 sm:$0xff]  }
  0x50   :  { %v979_v14 = vld [vmem:[#allocation9 + $0x16c] ss:$16 sps:$4 sm:$0xff]   ;;  %v981_v15 = vld [vmem:[#allocation9 + $0x160] ss:$16 sps:$4 sm:$0xff]   ;;  %v982_v16 = vld [vmem:[#allocation9 + $0x168] ss:$16 sps:$4 sm:$0xff]  }
  0x51   :  { %v983_v17 = vld [vmem:[#allocation9 + $0x184] ss:$16 sps:$4 sm:$0xff]   ;;  %v985_v18 = vld [vmem:[#allocation9 + $0x18c] ss:$16 sps:$4 sm:$0xff]   ;;  %v987_v19 = vld [vmem:[#allocation9 + $0x180] ss:$16 sps:$4 sm:$0xff]  }
  0x52   :  { %321 = vmatpush1.bf16.msra.mxu0 %v969_v7  ;;  %362 = vmatpush1.bf16.msra.mxu1 %v970_v8  ;;  %v988_v20 = vld [vmem:[#allocation9 + $0x188] ss:$16 sps:$4 sm:$0xff]   ;;  %v989_v21 = vld [vmem:[#allocation9 + $0x1a4] ss:$16 sps:$4 sm:$0xff]   ;;  %v991_v22 = vld [vmem:[#allocation9 + $0x1ac] ss:$16 sps:$4 sm:$0xff]  }
  0x53   :  { %322 = vmatprep.subr.bf16.mxu0 %v971_v9  ;;  %363 = vmatprep.subr.bf16.mxu1 %v973_v10  ;;  %v993_v23 = vld [vmem:[#allocation9 + $0x1a0] ss:$16 sps:$4 sm:$0xff]   ;;  %v994_v24 = vld [vmem:[#allocation9 + $0x1a8] ss:$16 sps:$4 sm:$0xff]   ;;  %v995_v25 = vld [vmem:[#allocation9 + $0x1c4] ss:$16 sps:$4 sm:$0xff]  }
  0x54   :  { %v997_v26 = vld [vmem:[#allocation9 + $0x1cc] ss:$16 sps:$4 sm:$0xff]   ;;  %v86_v27 = vld [vmem:[%s1365_s1] sm:$0x3]  ;;  %v1000_v29 = vld [vmem:[#allocation9 + $0x1c8] ss:$16 sps:$4 sm:$0xff]  }
  0x55   :  { %87 = vst [vmem:[#allocation2] sm:$0x3] %v86_v27  ;;  %v999_v28 = vld [vmem:[#allocation9 + $0x1c0] ss:$16 sps:$4 sm:$0xff]   ;;  %v1001_v30 = vld [vmem:[#allocation9 + $0x1e4] ss:$16 sps:$4 sm:$0xff]  }
  0x56   :  { %323 = vmatpush1.bf16.msra.mxu0 %v975_v11  ;;  %364 = vmatpush1.bf16.msra.mxu1 %v976_v12  ;;  %v1003_v31 = vld [vmem:[#allocation9 + $0x1ec] ss:$16 sps:$4 sm:$0xff]   ;;  %v1005_v32 = vld [vmem:[#allocation9 + $0x1e0] ss:$16 sps:$4 sm:$0xff]   ;;  %v1006_v33 = vld [vmem:[#allocation9 + $0x1e8] ss:$16 sps:$4 sm:$0xff]  }
  0x57   :  { %324 = vmatprep.subr.bf16.mxu0 %v977_v13  ;;  %365 = vmatprep.subr.bf16.mxu1 %v979_v14  ;;  %v1009_v35 = vld [vmem:[#allocation9 + $0x4] ss:$16 sps:$4 sm:$0xff]   ;;  %v1012_v36 = vld [vmem:[#allocation9 + $0xc] ss:$16 sps:$4 sm:$0xff]   ;;  %v1007_v38 = vld [vmem:[#allocation9] ss:$16 sps:$4 sm:$0xff]  }
  0x58   :  { %v1010_v39 = vld [vmem:[#allocation9 + $0x8] ss:$16 sps:$4 sm:$0xff]   ;;  %v1015_v40 = vld [vmem:[#allocation9 + $0x24] ss:$16 sps:$4 sm:$0xff]   ;;  %v1018_v41 = vld [vmem:[#allocation9 + $0x2c] ss:$16 sps:$4 sm:$0xff]  }
  0x59   :  { %v1013_v42 = vld [vmem:[#allocation9 + $0x20] ss:$16 sps:$4 sm:$0xff]   ;;  %v1016_v43 = vld [vmem:[#allocation9 + $0x28] ss:$16 sps:$4 sm:$0xff]   ;;  %v1021_v44 = vld [vmem:[#allocation9 + $0x44] ss:$16 sps:$4 sm:$0xff]  }
  0x5a   :  { %325 = vmatpush1.bf16.msra.mxu0 %v981_v15  ;;  %366 = vmatpush1.bf16.msra.mxu1 %v982_v16  ;;  %v1024_v45 = vld [vmem:[#allocation9 + $0x4c] ss:$16 sps:$4 sm:$0xff]   ;;  %v1019_v46 = vld [vmem:[#allocation9 + $0x40] ss:$16 sps:$4 sm:$0xff]   ;;  %v1022_v47 = vld [vmem:[#allocation9 + $0x48] ss:$16 sps:$4 sm:$0xff]  }
  0x5b   :  { %326 = vmatprep.subr.bf16.mxu0 %v983_v17  ;;  %367 = vmatprep.subr.bf16.mxu1 %v985_v18  ;;  %v1027_v48 = vld [vmem:[#allocation9 + $0x64] ss:$16 sps:$4 sm:$0xff]   ;;  %v1030_v49 = vld [vmem:[#allocation9 + $0x6c] ss:$16 sps:$4 sm:$0xff]   ;;  %v1025_v50 = vld [vmem:[#allocation9 + $0x60] ss:$16 sps:$4 sm:$0xff]  }
  0x5c   :  { %v92_v34 = vld [vmem:[#allocation2] sm:$0x3]  ;;  %v1033_v52 = vld [vmem:[#allocation9 + $0x84] ss:$16 sps:$4 sm:$0xff]   ;;  %v1036_v53 = vld [vmem:[#allocation9 + $0x8c] ss:$16 sps:$4 sm:$0xff]  }
  0x5d   :  { %v93_v37 = vpack.c.bf16 %v92_v34, %v92_v34  ;;  %v1028_v51 = vld [vmem:[#allocation9 + $0x68] ss:$16 sps:$4 sm:$0xff]   ;;  %v1031_v54 = vld [vmem:[#allocation9 + $0x80] ss:$16 sps:$4 sm:$0xff]   ;;  %v1039_v56 = vld [vmem:[#allocation9 + $0xa4] ss:$16 sps:$4 sm:$0xff]  }
  0x5e   :  { %327 = vmatpush1.bf16.msra.mxu0 %v987_v19  ;;  %368 = vmatpush1.bf16.msra.mxu1 %v988_v20  ;;  %v1034_v55 = vld [vmem:[#allocation9 + $0x88] ss:$16 sps:$4 sm:$0xff]   ;;  %v1042_v57 = vld [vmem:[#allocation9 + $0xac] ss:$16 sps:$4 sm:$0xff]   ;;  %v1037_v58 = vld [vmem:[#allocation9 + $0xa0] ss:$16 sps:$4 sm:$0xff]  }
  0x5f   :  { %328 = vmatprep.subr.bf16.mxu0 %v989_v21  ;;  %369 = vmatprep.subr.bf16.mxu1 %v991_v22  ;;  %v1040_v59 = vld [vmem:[#allocation9 + $0xa8] ss:$16 sps:$4 sm:$0xff]   ;;  %v1045_v60 = vld [vmem:[#allocation9 + $0xc4] ss:$16 sps:$4 sm:$0xff]   ;;  %v1048_v61 = vld [vmem:[#allocation9 + $0xcc] ss:$16 sps:$4 sm:$0xff]  }
  0x60   :  { %v1043_v62 = vld [vmem:[#allocation9 + $0xc0] ss:$16 sps:$4 sm:$0xff]   ;;  %v1046_v63 = vld [vmem:[#allocation9 + $0xc8] ss:$16 sps:$4 sm:$0xff]   ;;  %v1054_v1 = vld [vmem:[#allocation9 + $0xec] ss:$16 sps:$4 sm:$0xff]  }
  0x61   :  { %v1049_v2 = vld [vmem:[#allocation9 + $0xe0] ss:$16 sps:$4 sm:$0xff]   ;;  %v1052_v3 = vld [vmem:[#allocation9 + $0xe8] ss:$16 sps:$4 sm:$0xff]   ;;  %v90_v4 = vld [vmem:[#allocation4] sm:$0x3] }
  0x62   :  { %329 = vmatpush1.bf16.msra.mxu0 %v993_v23  ;;  %370 = vmatpush1.bf16.msra.mxu1 %v994_v24  ;;  %v91_v5 = vpack.c.bf16 %v90_v4, %v90_v4  ;;  %v1055_v6 = vld [vmem:[#allocation10] sm:$0xff]   ;;  %v1230_v7 = vmov 0.0   ;;  %v88_v8 = vld [vmem:[#allocation7] sm:$0x3]  ;;  %v1056_v9 = vld [vmem:[#allocation10 + $0x8] sm:$0xff]   ;;  %v644_v24 = vlaneseq }
  0x63   :  { %330 = vmatprep.subr.bf16.mxu0 %v995_v25  ;;  %371 = vmatprep.subr.bf16.mxu1 %v997_v26  ;;  %89 = vst [vmem:[#allocation3] sm:$0x3] %v88_v8  ;;  %v1057_v10 = vld [vmem:[#allocation10 + $0x10] sm:$0xff]   ;;  %v1058_v11 = vld [vmem:[#allocation10 + $0x18] sm:$0xff]   ;;  %v1059_v12 = vld [vmem:[#allocation10 + $0x20] sm:$0xff]  }
  0x64   :  { %v1060_v13 = vld [vmem:[#allocation10 + $0x28] sm:$0xff]   ;;  %v1061_v14 = vld [vmem:[#allocation10 + $0x30] sm:$0xff]   ;;  %v1062_v15 = vld [vmem:[#allocation10 + $0x38] sm:$0xff]   ;;  %v645_v25 = vshrl.u32 %v644_v24, 7 }
  0x65   :  { %v642_v27 = vld [vmem:[%s1368_s4] sm:$0xf]  ;;  %s1232_s4 = smov [#allocation13]  }
  0x66   :  { %331 = vmatpush1.bf16.msra.mxu0 %v999_v28  ;;  %372 = vmatpush1.bf16.msra.mxu1 %v1000_v29  ;;  %v646_v26 = vsub.s32 0, %v645_v25  ;;  %v650_v28 = vsub.s32 1, %v645_v25  ;;  %s826_s12 = sshll.u32 %s1232_s4, 4  ;;  %s827_s12 = int_to_ptr.vmem [resolvable:$true] %s826_s12 }
  0x67   :  { %332 = vmatprep.subr.bf16.mxu0 %v1001_v30  ;;  %373 = vmatprep.subr.bf16.mxu1 %v1003_v31  ;;  %s1167_s13 = scalar_lea.vmem %s827_s12, 64  ;;  %p1172_p5 = scmp.lt.s32.totalorder %s827_s12, %s827_s12 }
  0x68   :  { %v647_v29 = vrot.slane %v642_v27, %v646_v26  ;;  %p1168_p4 = scmp.ne.s32.totalorder %s827_s12, %s1167_s13  ;;  %p1173_p6 = scmp.lt.s32.totalorder %s1167_s13, %s1167_s13 }
  0x6a   :  { %333 = vmatpush1.bf16.msra.mxu0 %v1005_v32  ;;  %374 = vmatpush1.bf16.msra.mxu1 %v1006_v33  ;;  %v651_v32 = vrot.slane %v642_v27, %v650_v28  ;;  %p1174_p7 = por %p1173_p6, %p1172_p5 }
  0x6b   :  { %560 = vmatprep.subr.bf16.mxu0 %v1009_v35  ;;  %601 = vmatprep.subr.bf16.mxu1 %v1012_v36 }
  0x6c   :  { %p1175_p8 = pnand %p1174_p7, %p1168_p4 }
  0x6d   :  { %351 = vmatmul.mubr.bf16.vlgmr.msra.gmra.mrb[0].mxu0 %v93_v37  ;;  %392 = vmatmul.mubr.bf16.vlgmr.msra.gmra.mrb[0].mxu1 %v93_v37 }
  0x6e   :  { %561 = vmatpush1.bf16.msra.mxu0 %v1007_v38  ;;  %602 = vmatpush1.bf16.msra.mxu1 %v1010_v39  ;;  %v658_v39 = vsub.s32 3, %v645_v25 }
  0x6f   :  { %562 = vmatprep.subr.bf16.mxu0 %v1015_v40  ;;  %603 = vmatprep.subr.bf16.mxu1 %v1018_v41 }
  0x70   :  { %592 = vmatprep.mubr.bf16.mxu0 %v1229_v0  ;;  %633 = vmatprep.mubr.bf16.mxu1 %v1229_v0  ;;  %v1051_v0 = vld [vmem:[#allocation9 + $0xe4] ss:$16 sps:$4 sm:$0xff]  }
  0x72   :  { %563 = vmatpush1.bf16.msra.mxu0 %v1013_v42  ;;  %604 = vmatpush1.bf16.msra.mxu1 %v1016_v43 }
  0x73   :  { %564 = vmatprep.subr.bf16.mxu0 %v1021_v44  ;;  %605 = vmatprep.subr.bf16.mxu1 %v1024_v45 }
  0x76   :  { %565 = vmatpush1.bf16.msra.mxu0 %v1019_v46  ;;  %606 = vmatpush1.bf16.msra.mxu1 %v1022_v47 }
  0x77   :  { %566 = vmatprep.subr.bf16.mxu0 %v1027_v48  ;;  %607 = vmatprep.subr.bf16.mxu1 %v1030_v49  ;;  %v659_v48 = vrot.slane %v642_v27, %v658_v39  ;;  %v654_v49 = vsub.s32 2, %v645_v25 }
  0x7a   :  { %567 = vmatpush1.bf16.msra.mxu0 %v1025_v50  ;;  %608 = vmatpush1.bf16.msra.mxu1 %v1028_v51  ;;  %v655_v51 = vrot.slane %v642_v27, %v654_v49 }
  0x7b   :  { %568 = vmatprep.subr.bf16.mxu0 %v1033_v52  ;;  %609 = vmatprep.subr.bf16.mxu1 %v1036_v53 }
  0x7e   :  { %569 = vmatpush1.bf16.msra.mxu0 %v1031_v54  ;;  %610 = vmatpush1.bf16.msra.mxu1 %v1034_v55 }
  0x7f   :  { %570 = vmatprep.subr.bf16.mxu0 %v1039_v56  ;;  %611 = vmatprep.subr.bf16.mxu1 %v1042_v57 }
  0x82   :  { %571 = vmatpush1.bf16.msra.mxu0 %v1037_v58  ;;  %612 = vmatpush1.bf16.msra.mxu1 %v1040_v59 }
  0x83   :  { %572 = vmatprep.subr.bf16.mxu0 %v1045_v60  ;;  %613 = vmatprep.subr.bf16.mxu1 %v1048_v61  ;;  %v687_v60 = vld [vmem:[#allocation3] sm:$0x3] }
  0x86   :  { %573 = vmatpush1.bf16.msra.mxu0 %v1043_v62  ;;  %614 = vmatpush1.bf16.msra.mxu1 %v1046_v63 }
  0x87   :  { %574 = vmatprep.subr.bf16.mxu0 %v1051_v0  ;;  %615 = vmatprep.subr.bf16.mxu1 %v1054_v1 }
  0x8a   :  { %575 = vmatpush1.bf16.msra.mxu0 %v1049_v2  ;;  %616 = vmatpush1.bf16.msra.mxu1 %v1052_v3 }
  0x8b   :  { %926 = vmatprep.subr.bf16.mxu0 %v1230_v7 }
  0x8d   :  { %593 = vmatmul.mubr.bf16.vlgmr.msra.gmra.mrb[4].mxu0 %v91_v5  ;;  %634 = vmatmul.mubr.bf16.vlgmr.msra.gmra.mrb[4].mxu1 %v91_v5 }
  0x8e   :  { %927 = vmatpush3.bf16.msra.mxu0 %v1055_v6  ;;  %942 = vmatprep.mubr.msk.bf16.mxu0 %vm1231_vm0, %v1230_v7 }
  0x8f   :  { %928 = vmatprep.subr.bf16.mxu0 %v1230_v7 }
  0x92   :  { %929 = vmatpush3.bf16.msra.mxu0 %v1056_v9 }
  0x93   :  { %930 = vmatprep.subr.bf16.mxu0 %v1230_v7 }
  0x96   :  { %931 = vmatpush3.bf16.msra.mxu0 %v1057_v10 }
  0x97   :  { %932 = vmatprep.subr.bf16.mxu0 %v1230_v7 }
  0x9a   :  { %933 = vmatpush3.bf16.msra.mxu0 %v1058_v11 }
  0x9b   :  { %934 = vmatprep.subr.bf16.mxu0 %v1230_v7 }
  0x9e   :  { %935 = vmatpush3.bf16.msra.mxu0 %v1059_v12 }
  0x9f   :  { %936 = vmatprep.subr.bf16.mxu0 %v1230_v7 }
  0xa2   :  { %937 = vmatpush3.bf16.msra.mxu0 %v1060_v13 }
  0xa3   :  { %938 = vmatprep.subr.bf16.mxu0 %v1230_v7 }
  0xa6   :  { %939 = vmatpush3.bf16.msra.mxu0 %v1061_v14 }
  0xa7   :  { %940 = vmatprep.subr.bf16.mxu0 %v1230_v7 }
  0xaa   :  { %941 = vmatpush3.bf16.msra.mxu0 %v1062_v15 }
 0x140   :  { %v352_v16 = vpop.f32.mrb[0].mxu0  ;;  %v393_v17 = vpop.f32.mrb[0].mxu1 }
 0x141   :  { %v354_v18 = vpop.f32.mrb[1].mxu0  ;;  %v395_v19 = vpop.f32.mrb[1].mxu1 }
 0x142   :  { %v356_v20 = vpop.f32.mrb[2].mxu0  ;;  %v397_v21 = vpop.f32.mrb[2].mxu1 }
 0x143   :  { %v357_v22 = vpop.f32.mrb[3].mxu0  ;;  %v398_v23 = vpop.f32.mrb[3].mxu1 }
 0x160   :  { %v594_v30 = vpop.f32.mrb[4].mxu0  ;;  %v635_v31 = vpop.f32.mrb[4].mxu1 }
 0x161   :  { %v595_v33 = vadd.f32 %v594_v30, %v352_v16  ;;  %v636_v34 = vadd.f32 %v635_v31, %v393_v17  ;;  %v596_v35 = vpop.f32.mrb[5].mxu0  ;;  %v637_v36 = vpop.f32.mrb[5].mxu1 }
 0x162   :  { %v597_v37 = vadd.f32 %v596_v35, %v354_v18  ;;  %v638_v38 = vadd.f32 %v637_v36, %v395_v19  ;;  %v598_v40 = vpop.f32.mrb[6].mxu0  ;;  %v639_v41 = vpop.f32.mrb[6].mxu1 }
 0x163   :  { %v664_v42 = vadd.f32 %v647_v29, %v595_v33  ;;  %v599_v43 = vpop.f32.mrb[7].mxu0  ;;  %v640_v44 = vpop.f32.mrb[7].mxu1  ;;  %v666_v53 = vadd.f32 %v655_v51, %v636_v34 }
 0x164   :  { %v665_v45 = vadd.f32 %v651_v32, %v597_v37  ;;  %v667_v50 = vadd.f32 %v659_v48, %v638_v38 }
 0x165   :  { %v905_v46 = vmul.f32 -1.442695, %v664_v42 }
 0x166   :  { %v906_v47 = vmul.f32 -1.442695, %v665_v45  ;;  %v907_v52 = vmul.f32 -1.442695, %v667_v50 }
 0x167   :  { %1063 = vpow2.f32 %v905_v46 }
 0x168   :  { %1065 = vpow2.f32 %v906_v47 }
 0x169   :  { %1067 = vpow2.f32 %v907_v52 }
 0x16a   :  { %1069 = vtanh.f32 %v666_v53 }
 0x171   :  { %v1064_v54 = vpop.eup %1063 }
 0x172   :  { %v1066_v55 = vpop.eup %1065  ;;  %v671_v56 = vadd.f32 1.0, %v1064_v54 }
 0x173   :  { %v677_v57 = vadd.f32 1.0, %v1066_v55  ;;  %v1068_v58 = vpop.eup %1067 }
 0x174   :  { %1071 = vrcp.f32 %v671_v56  ;;  %v1070_v59 = vpop.eup %1069  ;;  %v684_v0 = vadd.f32 1.0, %v1068_v58 }
 0x175   :  { %1073 = vrcp.f32 %v677_v57 }
 0x176   :  { %1075 = vrcp.f32 %v684_v0 }
 0x17e   :  { %v1072_v61 = vpop.eup %1071 }
 0x17f   :  { %v1074_v62 = vpop.eup %1073  ;;  %v689_v63 = vmul.f32 %v1072_v61, %v1070_v59 }
 0x180   :  { %v688_v1 = vmul.f32 %v1074_v62, %v687_v60  ;;  %v1076_v3 = vpop.eup %1075 }
 0x182   :  { %v690_v2 = vadd.f32 %v689_v63, %v688_v1 }
 0x184   :  { %693 = vst [vmem:[#allocation3] sm:$0x3] %v690_v2  ;;  %809 = vst [vmem:[#allocation13 + $0x2] sm:$0x3] %v690_v2  ;;  %1077 = vtanh.f32 %v690_v2 }
 0x18e   :  { %v1078_v4 = vpop.eup %1077 }
 0x18f   :  { %v692_v5 = vmul.f32 %v1078_v4, %v1076_v3 }
 0x191   :  { %694 = vst [vmem:[#allocation2] sm:$0x3] %v692_v5  ;;  %v695_v6 = vpack.c.bf16 %v692_v5, %v692_v5  ;;  %808 = vst [vmem:[#allocation13] sm:$0x3] %v692_v5 }
 0x193   :  { %943 = vmatmul.mubr.bf16.vlgmr.msra.gmra.mrb[8].mxu0 %v695_v6 }
 0x194   :  { %1178 = shalt.err (!%p1175_p8)
}
 0x195   :  { %s1179_s16 = scalar_lea.hbm %s1372_s8, 64 }
 0x196   :  { %p1180_p9 = scmp.ne.s32.totalorder %s1372_s8, %s1179_s16  ;;  %p1183_p10 = scmp.lt.u32.totalorder %s1179_s16, %s1372_s8 }
 0x198   :  { %p1185_p11 = pnand %p1183_p10, %p1180_p9 }
 0x19a   :  { %1188 = shalt.err (!%p1185_p11)
}
 0x19b   :  { %829 = dma.vmem_to_hbm [thread:$0]  %s827_s12, 64, %s1372_s8, [#allocation14]   ;;  %v908_v7 = vld [vmem:[%s1370_s6] ss:$0 sm:$0xff] }
 0x19c   :  { %s1233_s23 = smov [#allocation12]  }
 0x19d   :  { %s816_s24 = sshll.u32 %s1233_s23, 4  ;;  %s817_s24 = int_to_ptr.vmem [resolvable:$true] %s816_s24 }
 0x19e   :  { %s1189_s25 = scalar_lea.vmem %s817_s24, 32  ;;  %p1194_p13 = scmp.lt.s32.totalorder %s817_s24, %s817_s24 }
 0x19f   :  { %p1190_p12 = scmp.ne.s32.totalorder %s817_s24, %s1189_s25  ;;  %p1195_p0 = scmp.lt.s32.totalorder %s1189_s25, %s1189_s25 }
 0x1a1   :  { %p1196_p1 = por %p1195_p0, %p1194_p13 }
 0x1a3   :  { %p1197_p2 = pnand %p1196_p1, %p1190_p12 }
 0x266   :  { %v801_v8 = vpop.f32.mrb[8].mxu0 }
 0x267   :  { %v802_v9 = vadd.f32 %v908_v7, %v801_v8  ;;  %v944_v10 = vpop.f32.mrb[9].mxu0 }
 0x268   :  { %v804_v11 = vpop.f32.mrb[10].mxu0 }
 0x269   :  { %807 = vst [vmem:[#allocation12] sm:$0x3] %v802_v9  ;;  %v945_v12 = vpop.f32.mrb[11].mxu0 }
 0x26a   :  { %1200 = shalt.err (!%p1197_p2)
}
 0x26b   :  { %s1201_s6 = scalar_lea.hbm %s1371_s7, 32 }
 0x26c   :  { %p1202_p3 = scmp.ne.s32.totalorder %s1371_s7, %s1201_s6  ;;  %p1205_p4 = scmp.lt.u32.totalorder %s1201_s6, %s1371_s7 }
 0x26e   :  { %p1207_p5 = pnand %p1205_p4, %p1202_p3 }
 0x270   :  { %1210 = shalt.err (!%p1207_p5)
}
 0x271   :  { %819 = dma.vmem_to_hbm [thread:$0]  %s817_s24, 32, %s1371_s7, [#allocation6]  }
 0x272   :  { %1217 = dma.done.wait [#allocation6], 32  }
 0x273   :  { %1218 = vsyncadd [#allocation6], 4294967264 }
 0x274   :  { %1219 = dma.done.wait [#allocation14], 64  }
 0x275   :  { %1220 = vsyncadd [#allocation14], 4294967232 }
 0x276   :  { %836 = vsyncpa [#allocation5], 1 }
 0x277   :  { %837 = vsyncpa [#allocation8], 1 }
 0x278   :  { %838 = vsyncpa [#allocation11], 1 }
 0x279   :  { %839 = vsyncpa [#allocation6], 1 }
 0x27a   :  { %840 = vsyncpa [#allocation14], 1 }

</bundles_post_ra>
